<compile_context>
chip_gen: v7x
topology: tpu7x:2x2x1
jax: 0.10.0
libtpu: 0.0.40
codegen_flags: <defaults>
</compile_context>

<pallas_src>
import jax
import jax.numpy as jnp
from jax import lax
from jax.experimental import pallas as pl
from jax.experimental.pallas import tpu as pltpu


# ----------------------------------------------------------------------------
# In-kernel encode for ONE graph:
#   GCNConv(normalize=False, add_self_loops=False) -> relu -> GraphNorm
# Sparse CSR aggregation (scalar-prefetched offsets/cols), no dense adjacency.
# ----------------------------------------------------------------------------
def _encode_graph(row_off_ref, col_ref, x_ref, w_ref, pkg_ref, wgt_ref, xw_ref, h_ref):
    b = pl.program_id(0)
    N = x_ref.shape[0]
    Fout = w_ref.shape[1]

    # X @ W for this graph's N nodes. W / pkg / wgt index_maps are constant -> DMA'd once and
    # kept resident in VMEM across the whole grid.
    xw_ref[...] = jnp.dot(x_ref[...], w_ref[...], preferred_element_type=jnp.float32)

    # Sparse aggregation: h[i] = sum_{e : dst(e) == global node i} w_e * XW[src(e)]
    # (source_to_target flow, raw edge weights since normalize=False, no self loops).
    def row_body(i, carry):
        lo = row_off_ref[b * N + i]
        hi = row_off_ref[b * N + i + 1]

        def edge_body(e, acc):
            j = col_ref[e]                                      # local source node index (SMEM)
            return acc + wgt_ref[pl.ds(e, 1), :] * xw_ref[pl.ds(j, 1), :]

        acc = lax.fori_loop(lo, hi, edge_body, jnp.zeros((1, Fout), jnp.float32))
        h_ref[pl.ds(i, 1), :] = acc
        return carry

    lax.fori_loop(0, N, row_body, 0)

    # packed params: row0 = conv bias, row1 = GraphNorm weight, row2 = bias, row3 = mean_scale
    conv_b = pkg_ref[0:1, :]
    gn_w = pkg_ref[1:2, :]
    gn_b = pkg_ref[2:3, :]
    gn_ms = pkg_ref[3:4, :]

    h = jnp.maximum(h_ref[...] + conv_b, 0.0)                   # conv bias + act = torch.relu
    # GraphNorm over the nodes of this graph (PyG: biased var, eps=1e-5)
    mean = jnp.mean(h, axis=0, keepdims=True)
    centered = h - gn_ms * mean
    var = jnp.mean(centered * centered, axis=0, keepdims=True)
    return centered * lax.rsqrt(var + 1e-5) * gn_w + gn_b


# ----------------------------------------------------------------------------
# Kernels: fused encode + InnerProductDecoder, and a standalone encode block
# (only used when graphconvblocks > 2 would execute hidden blocks).
# ----------------------------------------------------------------------------
def gcn_decoder_fused_kernel(row_off_ref, col_ref, x_ref, w_ref, pkg_ref, wgt_ref,
                             o_ref, xw_ref, h_ref):
    z = _encode_graph(row_off_ref, col_ref, x_ref, w_ref, pkg_ref, wgt_ref, xw_ref, h_ref)
    # InnerProductDecoder: sigmoid(Z @ Z^T).  Contract the LAST dim of both operands so the
    # MXU consumes Z directly twice (no transposed VMEM temp).
    adj = lax.dot_general(z, z, (((1,), (1,)), ((), ())),
                          preferred_element_type=jnp.float32)
    o_ref[0] = jax.nn.sigmoid(adj)


def gcn_block_kernel(row_off_ref, col_ref, x_ref, w_ref, pkg_ref, wgt_ref,
                     z_ref, xw_ref, h_ref):
    z_ref[...] = _encode_graph(row_off_ref, col_ref, x_ref, w_ref, pkg_ref, wgt_ref,
                               xw_ref, h_ref)


# ----------------------------------------------------------------------------
# Wrappers: grid over graphs, scalar-prefetched CSR, resident W / packed params.
# ----------------------------------------------------------------------------
def _pallas_gcn_call(kernel, out_shape, out_spec, csr, x_flat, params, B, N):
    row_off, col, wgt = csr
    Fin = x_flat.shape[1]
    Fout = params["w"].shape[1]
    grid_spec = pltpu.PrefetchScalarGridSpec(
        num_scalar_prefetch=2,                                        # row_off + col -> SMEM
        grid=(B,),
        in_specs=[
            pl.BlockSpec((N, Fin), lambda b, ro, ci: (b, 0)),         # this graph's node feats
            pl.BlockSpec((Fin, Fout), lambda b, ro, ci: (0, 0)),      # W (resident)
            pl.BlockSpec((4, Fout), lambda b, ro, ci: (0, 0)),        # packed bias/GraphNorm
            pl.BlockSpec(tuple(wgt.shape), lambda b, ro, ci: (0, 0)),  # edge weights (resident)
        ],
        out_specs=out_spec,
        scratch_shapes=[pltpu.VMEM((N, Fout), jnp.float32),           # XW
                        pltpu.VMEM((N, Fout), jnp.float32)],          # aggregated H
    )
    return pl.pallas_call(
        kernel,
        out_shape=out_shape,
        grid_spec=grid_spec,
        compiler_params=pltpu.CompilerParams(
            dimension_semantics=("parallel",)),    # graphs independent -> v7x megacore sharding
    )(row_off, col, x_flat, params["w"], params["pkg"], wgt)


def gcn_decoder_fused(csr, x_flat, params, B, N):
    return _pallas_gcn_call(
        gcn_decoder_fused_kernel,
        jax.ShapeDtypeStruct((B, N, N), jnp.float32),
        pl.BlockSpec((1, N, N), lambda b, ro, ci: (b, 0, 0)),
        csr, x_flat, params, B, N)


def gcn_block(csr, x_flat, params, B, N):
    Fout = params["w"].shape[1]
    return _pallas_gcn_call(
        gcn_block_kernel,
        jax.ShapeDtypeStruct((B * N, Fout), jnp.float32),
        pl.BlockSpec((N, Fout), lambda b, ro, ci: (b, 0)),
        csr, x_flat, params, B, N)


# ----------------------------------------------------------------------------
# Glue: build CSR (sorted-by-destination) from PyG-style edge_index / edge_attr.
# Uses sort / gather / searchsorted only — no TPU scatter anywhere.
# ----------------------------------------------------------------------------
def build_csr(edge_index, edge_attr, B, N):
    src, dst = edge_index[0], edge_index[1]
    order = jnp.argsort(dst)
    dst_s = dst[order]
    src_s = src[order]
    w_s = edge_attr[order].astype(jnp.float32)
    total = B * N
    row_off = jnp.searchsorted(
        dst_s, jnp.arange(total + 1, dtype=dst_s.dtype)).astype(jnp.int32)   # (B*N+1,)
    col = (src_s % N).astype(jnp.int32)            # local source index (PyG: no cross-graph edges)
    wgt = w_s.reshape(-1, 1)                       # (E, 1) VMEM-resident edge weights
    return row_off, col, wgt


# ----------------------------------------------------------------------------
# Parameter construction (deterministic, matching module __init__ shapes)
# ----------------------------------------------------------------------------
def init_gcn_block_params(key, in_channels, out_channels):
    # GCNConv: weight (in, out) glorot-like, bias zeros; GraphNorm: weight=1, bias=0, mean_scale=1
    scale = jnp.sqrt(6.0 / (in_channels + out_channels))
    w = jax.random.uniform(key, (in_channels, out_channels), jnp.float32, -scale, scale)
    conv_b = jnp.zeros((1, out_channels), jnp.float32)
    gn_w = jnp.ones((1, out_channels), jnp.float32)
    gn_b = jnp.zeros((1, out_channels), jnp.float32)
    gn_ms = jnp.ones((1, out_channels), jnp.float32)
    pkg = jnp.concatenate([conv_b, gn_w, gn_b, gn_ms], axis=0)   # (4, Fout): single DMA
    return dict(w=w, pkg=pkg)


def init_graphic_params(key, input_embedding_size, embedding_size, num_blocks):
    keys = jax.random.split(key, num_blocks)
    input_block = init_gcn_block_params(keys[0], input_embedding_size, embedding_size)
    # hidden blocks are declared with in_channels == input_embedding_size, exactly like the
    # reference create_graph_conv_block (they are not executed when num_blocks == 2).
    hidden_blocks = [
        init_gcn_block_params(keys[i], input_embedding_size, embedding_size)
        for i in range(1, num_blocks)
    ]
    return input_block, hidden_blocks


# ----------------------------------------------------------------------------
# GrapHiC forward
# ----------------------------------------------------------------------------
def graphic_forward(params, x_nodes, edge_index, edge_attr, batch_index, num_graphs):
    del batch_index                      # equal-sized PyG batching assumed (as in the reference)
    input_block, hidden_blocks = params
    total_nodes = x_nodes.shape[0]
    B = num_graphs
    N = total_nodes // B

    csr = build_csr(edge_index, edge_attr, B, N)

    # encode(): input block, then `for i in range(len(transform_blocks)-1)` hidden blocks.
    # With graphconvblocks=2 the hidden block is constructed but never executed, so the whole
    # forward (GCNConv -> relu -> GraphNorm -> InnerProductDecoder) is ONE fused pallas_call.
    executed_hidden = hidden_blocks[: len(hidden_blocks) - 1]    # faithful to the reference loop
    blocks = [input_block] + list(executed_hidden)

    h_flat = x_nodes                                             # (B*N, Fin), PyG concat layout
    for blk in blocks[:-1]:                                      # only runs if graphconvblocks > 2
        h_flat = gcn_block(csr, h_flat, blk, B, N)

    adj = gcn_decoder_fused(csr, h_flat, blocks[-1], B, N)       # fused last block + decoder

    # decode(): InnerProductDecoder output reshaped to (B, 1, N, N) as in the reference (glue)
    return adj.reshape(B, 1, N, N)


# ----------------------------------------------------------------------------
if __name__ == "__main__":
    B = 2               # graphs in the batch
    N = 16              # nodes per graph
    FIN = 4             # input_embedding_size
    EMB = 32            # hyperparameters['embedding_size']
    NUM_BLOCKS = 2      # hyperparameters['graphconvblocks']

    key = jax.random.PRNGKey(0)
    k_param, k_x, k_e = jax.random.split(key, 3)

    params = init_graphic_params(k_param, FIN, EMB, NUM_BLOCKS)

    # node features: (total_nodes, FIN)
    x_nodes = jax.random.normal(k_x, (B * N, FIN), jnp.float32)

    # chain graph (both directions) inside each graph, global node indexing like PyG batching
    src_list, dst_list = [], []
    for b in range(B):
        off = b * N
        for i in range(N - 1):
            src_list += [off + i, off + i + 1]
            dst_list += [off + i + 1, off + i]
    edge_index = jnp.array([src_list, dst_list], dtype=jnp.int32)    # (2, E)
    E = edge_index.shape[1]
    edge_attr = jax.random.uniform(k_e, (E,), jnp.float32, 0.1, 1.0)  # edge weights
    batch_index = jnp.repeat(jnp.arange(B, dtype=jnp.int32), N)

    out = graphic_forward(params, x_nodes, edge_index, edge_attr, batch_index, B)
    out = jax.block_until_ready(out)

    assert out.shape == (B, 1, N, N), out.shape
    assert bool(jnp.all(jnp.isfinite(out)))
    print("KERNEL_OK")
</pallas_src>

<mosaic_0001>
module attributes {stable_mosaic.version = 11 : i64} {
  func.func @gcn_decoder_fused_kernel(%arg0: i32, %arg1: memref<33xi32, #tpu.memory_space<smem>>, %arg2: memref<60xi32, #tpu.memory_space<smem>>, %arg3: memref<16x4xf32, #tpu.memory_space<vmem>>, %arg4: memref<4x32xf32, #tpu.memory_space<vmem>>, %arg5: memref<4x32xf32, #tpu.memory_space<vmem>>, %arg6: memref<60x1xf32, #tpu.memory_space<vmem>>, %arg7: memref<1x16x16xf32, #tpu.memory_space<vmem>>, %arg8: memref<16x32xf32, #tpu.memory_space<vmem>>, %arg9: memref<16x32xf32, #tpu.memory_space<vmem>>) attributes {dimension_semantics = [#tpu.dimension_semantics<parallel>], iteration_bounds = array<i64: 2>, scalar_prefetch = 2 : i64, scratch_operands = 2 : i64, tpu.core_type = #tpu.core_type<tc>, window_params = [{transform_indices = @transform_0, window_bounds = array<i64: 16, 4>}, {pipeline_mode = #tpu.pipeline_mode<synchronous>, transform_indices = @transform_1, window_bounds = array<i64: 4, 32>}, {pipeline_mode = #tpu.pipeline_mode<synchronous>, transform_indices = @transform_2, window_bounds = array<i64: 4, 32>}, {pipeline_mode = #tpu.pipeline_mode<synchronous>, transform_indices = @transform_3, window_bounds = array<i64: 60, 1>}, {transform_indices = @transform_4, window_bounds = array<i64: 1, 16, 16>}]} {
    %c0 = arith.constant 0 : index
    %c0_0 = arith.constant 0 : index
    %0 = vector.load %arg3[%c0, %c0_0] : memref<16x4xf32, #tpu.memory_space<vmem>>, vector<16x4xf32>
    %c0_1 = arith.constant 0 : index
    %c0_2 = arith.constant 0 : index
    %1 = vector.load %arg4[%c0_1, %c0_2] : memref<4x32xf32, #tpu.memory_space<vmem>>, vector<4x32xf32>
    %cst = arith.constant dense<0.000000e+00> : vector<16x32xf32>
    %2 = tpu.matmul %0, %1, %cst {dimension_numbers = #tpu.dot_dimension_numbers<[1], [0], [0], [1], [0, 0, 1, 1], [], []>} : vector<16x4xf32>, vector<4x32xf32>, vector<16x32xf32> -> vector<16x32xf32>
    %c0_3 = arith.constant 0 : index
    %c0_4 = arith.constant 0 : index
    %3 = vector.load %arg8[%c0_3, %c0_4] : memref<16x32xf32, #tpu.memory_space<vmem>>, vector<16x32xf32>
    tpu.vector_store %arg8[%c0_3, %c0_4], %2 {strides = array<i32>} : memref<16x32xf32, #tpu.memory_space<vmem>>, vector<16x32xf32>,
    %c0_i32 = arith.constant 0 : i32
    %c16_i32 = arith.constant 16 : i32
    %4 = arith.addi %c0_i32, %c16_i32 : i32
    %c1_i32 = arith.constant 1 : i32
    scf.for %arg10 = %c0_i32 to %4 step %c1_i32  : i32 {
      %c16_i32_24 = arith.constant 16 : i32
      %44 = arith.muli %arg0, %c16_i32_24 : i32
      %45 = arith.addi %44, %arg10 : i32
      %46 = arith.index_cast %45 : i32 to index
      %47 = memref.load %arg1[%46] : memref<33xi32, #tpu.memory_space<smem>>
      %c16_i32_25 = arith.constant 16 : i32
      %48 = arith.muli %arg0, %c16_i32_25 : i32
      %49 = arith.addi %48, %arg10 : i32
      %c1_i32_26 = arith.constant 1 : i32
      %50 = arith.addi %49, %c1_i32_26 : i32
      %51 = arith.index_cast %50 : i32 to index
      %52 = memref.load %arg1[%51] : memref<33xi32, #tpu.memory_space<smem>>
      %cst_27 = arith.constant 0.000000e+00 : f32
      %53 = vector.broadcast %cst_27 : f32 to vector<1x32xf32>
      %54 = arith.subi %52, %47 : i32
      %55 = arith.addi %47, %54 : i32
      %c1_i32_28 = arith.constant 1 : i32
      %56 = scf.for %arg11 = %47 to %55 step %c1_i32_28 iter_args(%arg12 = %53) -> (vector<1x32xf32>)  : i32 {
        %59 = arith.index_cast %arg11 : i32 to index
        %60 = memref.load %arg2[%59] : memref<60xi32, #tpu.memory_space<smem>>
        %61 = arith.index_cast %arg11 : i32 to index
        %c0_30 = arith.constant 0 : index
        %62 = vector.load %arg6[%61, %c0_30] : memref<60x1xf32, #tpu.memory_space<vmem>>, vector<1x1xf32>
        %63 = arith.index_cast %60 : i32 to index
        %c0_31 = arith.constant 0 : index
        %64 = vector.load %arg8[%63, %c0_31] : memref<16x32xf32, #tpu.memory_space<vmem>>, vector<1x32xf32>
        %65 = vector.broadcast %62 : vector<1x1xf32> to vector<1x32xf32>
        %66 = arith.mulf %65, %64 : vector<1x32xf32>
        %67 = arith.addf %arg12, %66 : vector<1x32xf32>
        scf.yield %67 : vector<1x32xf32>
      }
      %57 = arith.index_cast %arg10 : i32 to index
      %c0_29 = arith.constant 0 : index
      %58 = vector.load %arg9[%57, %c0_29] : memref<16x32xf32, #tpu.memory_space<vmem>>, vector<1x32xf32>
      tpu.vector_store %arg9[%57, %c0_29], %56 {strides = array<i32>} : memref<16x32xf32, #tpu.memory_space<vmem>>, vector<1x32xf32>,
    }
    %c16_i32_5 = arith.constant 16 : i32
    %c0_6 = arith.constant 0 : index
    %c0_7 = arith.constant 0 : index
    %5 = vector.load %arg5[%c0_6, %c0_7] : memref<4x32xf32, #tpu.memory_space<vmem>>, vector<1x32xf32>
    %c1 = arith.constant 1 : index
    %c0_8 = arith.constant 0 : index
    %6 = vector.load %arg5[%c1, %c0_8] : memref<4x32xf32, #tpu.memory_space<vmem>>, vector<1x32xf32>
    %c2 = arith.constant 2 : index
    %c0_9 = arith.constant 0 : index
    %7 = vector.load %arg5[%c2, %c0_9] : memref<4x32xf32, #tpu.memory_space<vmem>>, vector<1x32xf32>
    %c3 = arith.constant 3 : index
    %c0_10 = arith.constant 0 : index
    %8 = vector.load %arg5[%c3, %c0_10] : memref<4x32xf32, #tpu.memory_space<vmem>>, vector<1x32xf32>
    %c0_11 = arith.constant 0 : index
    %c0_12 = arith.constant 0 : index
    %9 = vector.load %arg9[%c0_11, %c0_12] : memref<16x32xf32, #tpu.memory_space<vmem>>, vector<16x32xf32>
    %10 = vector.broadcast %5 : vector<1x32xf32> to vector<16x32xf32>
    %11 = arith.addf %9, %10 : vector<16x32xf32>
    %cst_13 = arith.constant 0.000000e+00 : f32
    %12 = vector.broadcast %cst_13 : f32 to vector<16x32xf32>
    %13 = arith.maximumf %11, %12 : vector<16x32xf32>
    %cst_14 = arith.constant dense<0.000000e+00> : vector<32xf32>
    %14 = vector.multi_reduction <add>, %13, %cst_14 [0] : vector<16x32xf32> to vector<32xf32>
    %15 = vector.shape_cast %14 : vector<32xf32> to vector<1x32xf32>
    %cst_15 = arith.constant 1.600000e+01 : f32
    %16 = vector.broadcast %cst_15 : f32 to vector<1x32xf32>
    %17 = arith.divf %15, %16 : vector<1x32xf32>
    %18 = arith.mulf %8, %17 : vector<1x32xf32>
    %19 = vector.broadcast %18 : vector<1x32xf32> to vector<16x32xf32>
    %20 = arith.subf %13, %19 : vector<16x32xf32>
    %21 = arith.mulf %20, %20 : vector<16x32xf32>
    %cst_16 = arith.constant dense<0.000000e+00> : vector<32xf32>
    %22 = vector.multi_reduction <add>, %21, %cst_16 [0] : vector<16x32xf32> to vector<32xf32>
    %23 = vector.shape_cast %22 : vector<32xf32> to vector<1x32xf32>
    %cst_17 = arith.constant 1.600000e+01 : f32
    %24 = vector.broadcast %cst_17 : f32 to vector<1x32xf32>
    %25 = arith.divf %23, %24 : vector<1x32xf32>
    %cst_18 = arith.constant 9.99999974E-6 : f32
    %26 = vector.broadcast %cst_18 : f32 to vector<1x32xf32>
    %27 = arith.addf %25, %26 : vector<1x32xf32>
    %28 = math.rsqrt %27 : vector<1x32xf32>
    %29 = vector.broadcast %28 : vector<1x32xf32> to vector<16x32xf32>
    %30 = arith.mulf %20, %29 : vector<16x32xf32>
    %31 = vector.broadcast %6 : vector<1x32xf32> to vector<16x32xf32>
    %32 = arith.mulf %30, %31 : vector<16x32xf32>
    %33 = vector.broadcast %7 : vector<1x32xf32> to vector<16x32xf32>
    %34 = arith.addf %32, %33 : vector<16x32xf32>
    %cst_19 = arith.constant dense<0.000000e+00> : vector<16x16xf32>
    %35 = tpu.matmul %34, %34, %cst_19 {dimension_numbers = #tpu.dot_dimension_numbers<[1], [1], [0], [0], [0, 0, 1, 0], [], []>} : vector<16x32xf32>, vector<16x32xf32>, vector<16x16xf32> -> vector<16x16xf32>
    %36 = arith.negf %35 : vector<16x16xf32>
    %37 = math.exp %36 : vector<16x16xf32>
    %cst_20 = arith.constant 1.000000e+00 : f32
    %38 = vector.broadcast %cst_20 : f32 to vector<16x16xf32>
    %39 = arith.addf %38, %37 : vector<16x16xf32>
    %40 = arith.divf %38, %39 : vector<16x16xf32>
    %c0_21 = arith.constant 0 : index
    %c0_22 = arith.constant 0 : index
    %c0_23 = arith.constant 0 : index
    %41 = vector.load %arg7[%c0_21, %c0_22, %c0_23] : memref<1x16x16xf32, #tpu.memory_space<vmem>>, vector<1x16x16xf32>
    %42 = vector.shape_cast %41 : vector<1x16x16xf32> to vector<16x16xf32>
    %43 = vector.shape_cast %40 : vector<16x16xf32> to vector<1x16x16xf32>
    tpu.vector_store %arg7[%c0_21, %c0_22, %c0_23], %43 {strides = array<i32>} : memref<1x16x16xf32, #tpu.memory_space<vmem>>, vector<1x16x16xf32>,
    return
  }
  func.func @transform_0(%arg0: i32, %arg1: memref<33xi32, #tpu.memory_space<smem>>, %arg2: memref<60xi32, #tpu.memory_space<smem>>) -> (i32, i32) {
    %c0_i32 = arith.constant 0 : i32
    %c0_i32_0 = arith.constant 0 : i32
    return %arg0, %c0_i32 : i32, i32
  }
  func.func @transform_1(%arg0: i32, %arg1: memref<33xi32, #tpu.memory_space<smem>>, %arg2: memref<60xi32, #tpu.memory_space<smem>>) -> (i32, i32) {
    %c0_i32 = arith.constant 0 : i32
    %c0_i32_0 = arith.constant 0 : i32
    %c0_i32_1 = arith.constant 0 : i32
    return %c0_i32, %c0_i32_0 : i32, i32
  }
  func.func @transform_2(%arg0: i32, %arg1: memref<33xi32, #tpu.memory_space<smem>>, %arg2: memref<60xi32, #tpu.memory_space<smem>>) -> (i32, i32) {
    %c0_i32 = arith.constant 0 : i32
    %c0_i32_0 = arith.constant 0 : i32
    %c0_i32_1 = arith.constant 0 : i32
    return %c0_i32, %c0_i32_0 : i32, i32
  }
  func.func @transform_3(%arg0: i32, %arg1: memref<33xi32, #tpu.memory_space<smem>>, %arg2: memref<60xi32, #tpu.memory_space<smem>>) -> (i32, i32) {
    %c0_i32 = arith.constant 0 : i32
    %c0_i32_0 = arith.constant 0 : i32
    %c0_i32_1 = arith.constant 0 : i32
    return %c0_i32, %c0_i32_0 : i32, i32
  }
  func.func @transform_4(%arg0: i32, %arg1: memref<33xi32, #tpu.memory_space<smem>>, %arg2: memref<60xi32, #tpu.memory_space<smem>>) -> (i32, i32, i32) {
    %c0_i32 = arith.constant 0 : i32
    %c0_i32_0 = arith.constant 0 : i32
    %c0_i32_1 = arith.constant 0 : i32
    return %arg0, %c0_i32, %c0_i32_0 : i32, i32, i32
  }
}

</mosaic_0001>

<bundles_post_ra>
// kernel: tpu_custom_call.1
= control target key start
LH: loop header
LB: loop body
LE: loop exit
PB: predicated region body
PF: predicated region fallthrough
CT: control target
= control target key end

     0   :  { %s1040_s0 = inlined_call_operand.vmem [shape: s32[33], index: 0, kind: input, shape index: {}]   ;;  %s1041_s2 = inlined_call_operand.vmem [shape: f32[32,4], index: 2, kind: input, shape index: {}]   ;;  %s1042_s3 = inlined_call_operand.vmem [shape: f32[4,32], index: 3, kind: input, shape index: {}]   ;;  %s1043_s4 = inlined_call_operand.vmem [shape: f32[4,32], index: 4, kind: input, shape index: {}]   ;;  %s1044_s5 = inlined_call_operand.vmem [shape: f32[60,1], index: 5, kind: input, shape index: {}]   ;;  %s1045_s6 = inlined_call_operand.hbm [shape: f32[2,16,16], index: 6, kind: output, shape index: {}]   ;;  %s1046_s1 = inlined_call_operand.vmem [shape: s32[60], index: 1, kind: input, shape index: {}]  }
   0x1   :  { %s11_s23 = sshll.u32 %s1040_s0, 4  ;;  %s15_s26 = sshll.u32 %s1046_s1, 4  ;;  %s12_s23 = int_to_ptr.vmem [resolvable:$true] %s11_s23  ;;  %s16_s26 = int_to_ptr.vmem [resolvable:$true] %s15_s26 }
   0x2   :  { %s721_s27 = scalar_lea.vmem %s12_s23, 16  ;;  %p726_p1 = scmp.lt.s32.totalorder %s12_s23, %s12_s23 }
   0x3   :  { %p722_p0 = scmp.ne.s32.totalorder %s12_s23, %s721_s27  ;;  %p727_p2 = scmp.lt.s32.totalorder %s721_s27, %s721_s27 }
   0x5   :  { %p728_p3 = por %p727_p2, %p726_p1 }
   0x7   :  { %p729_p4 = pnand %p728_p3, %p722_p0 }
   0x9   :  { %732 = shalt.err (!%p729_p4)  }
   0xa   :  { %s843_s28 = smov [#allocation5]   ;;  %s733_s29 = scalar_lea.vmem %s16_s26, 16 }
   0xb   :  { %14 = dma.vmem_to_smem %s12_s23, 16, %s843_s28, [#allocation4] }
   0xc   :  { %p734_p5 = scmp.ne.s32.totalorder %s16_s26, %s733_s29  ;;  %p738_p6 = scmp.lt.s32.totalorder %s16_s26, %s16_s26 }
   0xd   :  { %p739_p7 = scmp.lt.s32.totalorder %s733_s29, %s733_s29 }
   0xf   :  { %p740_p8 = por %p739_p7, %p738_p6 }
  0x11   :  { %p741_p9 = pnand %p740_p8, %p734_p5 }
  0x13   :  { %744 = shalt.err (!%p741_p9)  }
  0x14   :  { %s844_s0 = smov [#allocation6]  }
  0x15   :  { %18 = dma.vmem_to_smem %s16_s26, 16, %s844_s0, [#allocation4] }
  0x16   :  { %805 = dma.done.wait [#allocation4], 32 }
  0x17   :  { %806 = vsyncadd [#allocation4], 4294967264 }
  0x18   :  { %20 = sfence }
  0x19   :  { %21 = vsyncpa [#allocation8], 0 }
  0x1a   :  { %23 = vsyncpa [#allocation8 + $0x1], 0  ;;  %s890_s1 = smov 0   ;;  %s892_s30 = smov 0  }
  0x1b   :  { %s894_s7 = smov 0   ;;  %s896_s8 = smov 0  }
  0x1c LB: > { %s911_s9 = sadd.s32 4294967295, %s825_s8   ;;  %s583_s10 = sadd.s32 4294967294, %s825_s8   ;;  %s825_s8 = sphi %s896_s8, %s1052_s8   ;;  %s821_s7 = sphi %s894_s7, %s1051_s7   ;;  %s817_s30 = sphi %s892_s30, %s1050_s30   ;;  %s813_s1 = sphi %s890_s1, %s1049_s1  }
  0x1d   : > { %s915_s11 = sadd.s32 1, %s825_s8   ;;  %s125_s12 = sadd.s32 1, %s821_s7 }
  0x1e   : > { %s122_s13 = ssub.s32 %s825_s8, %s915_s11  ;;  %p135_p10 = scmp.ne.s32.totalorder %s821_s7, %s817_s30 }
  0x1f   : > { %p123_p11 = scmp.eq.s32.totalorder %s122_s13, 0  ;;  %p136_p12 = scmp.eq.s32.totalorder %s911_s9, 1 }
  0x20   : > { %p141_p13 = scmp.ne.s32.totalorder %s817_s30, %s813_s1  ;;  %p142_p0 = scmp.eq.s32.totalorder %s583_s10, 1 }
  0x21   : > { %s926_s14 = scalar_select %p123_p11, %s821_s7, %s125_s12  }
  0x22   : > { %p928_p1 = por %p136_p12, %p135_p10  ;;  %p932_p2 = por %p142_p0, %p141_p13 }
  0x23   : > { %p586_p3 = scmp.ge.s32.totalorder %s825_s8, 1  ;;  %p178_p4 = scmp.lt.s32.totalorder %s825_s8, 3 }
  0x25   : > { %p179_p5 = pnand %p586_p3, %p178_p4 }
  0x26   : > { %s201_s17 = sand.u32 (!%p179_p5), 1, %s817_s30   ;;  %v212_v0 = vld [vmem:[%s1042_s3] sm:$0xf] (!%p179_p5)  ;;  %vm220_vm0 = vcmask (!%p179_p5), 1043456   ;;  %s588_s20 = sshll.u32 (!%p179_p5), %s911_s9, 1  ;;  %vm213_vm1 = vcmask (!%p179_p5), 31744  }
  0x27   : > { %182 = sbr.rel (%p179_p5) target bundleno = 756 (0x2f4), region = 36  ;;  %s587_s21 = sshll.u32 (!%p179_p5), %s201_s17, 4  ;;  %616 = vmatprep.subr.msk.mxu0 (!%p179_p5), %vm220_vm0, %v212_v0  ;;  %vm299_vm2 = vcmask (!%p179_p5), 261120  }
  0x28   : > { %p205_p6 = scmp.lt.s32.totalorder (!%p179_p5), %s588_s20, 3  ;;  %617 = vmatpush3.msk.msra.mxu0 (!%p179_p5), %vm220_vm0, %v212_v0  ;;  %s950_s26 = scalar_lea.vmem (!%p179_p5), [#allocation7], %s587_s21 }
  0x29   : > { %s952_s27 = smov (!%p179_p5), 0  }
  0x2e   : > { %s1054_s20 = smov (!%p205_p6, %s588_s20), 3 }
  0x2f   : > { %s589_s22 = sshll.u32 %s1054_s20, 3 }
  0x30   : > { %s208_s25 = scalar_lea.vmem %s1041_s2, %s589_s22 }
  0x31   : > { %v210_v1 = vld [vmem:[%s208_s25] sm:$0xff]  ;;  %v211_v2 = vld [vmem:[%s208_s25 + $0x8] sm:$0xff] }
  0x32   : > { %618 = vmatprep.mubr.msk.f32.mxu0 %vm213_vm1, %v210_v1 }
  0x33   : > { %619 = vmatmul.mubr.msk.f32.vlgmr.msra.gmra.mrb[0].mxu0 %vm213_vm1, %v211_v2 }
 0x106   : > { %v620_v3 = vpop.f32.mrb[0].mxu0 }
 0x107   : > { %301 = vst.msk [vmem:[#allocation2 + $0x8] sm:$0xff] %vm299_vm2, %v620_v3  ;;  %v290_v4 = vpop.f32.mrb[1].mxu0 }
 0x108   : > { %300 = vst.msk [vmem:[#allocation2] sm:$0xff] %vm299_vm2, %v290_v4 }
 0x109 LB: >> { %s593_s28 = sshll.u32 %s911_s9, 4  ;;  %v839_v5 = vmov 0.0   ;;  %s829_s27 = sphi %s952_s27, %s307_s27  }
 0x10a   : >> { %s309_s29 = sadd.s32 %s829_s27, %s593_s28 }
 0x10b   : >> { %s310_s0 = sld [smem:[#allocation5 + %s309_s29]]   ;;  %s311_s10 = sadd.s32 1, %s309_s29 }
 0x10c   : >> { %s312_s12 = sld [smem:[#allocation5 + %s311_s10]] }
 0x112   : >> { %p550_p7 = scmp.ge.s32.totalorder %s310_s0, %s312_s12 }
 0x113   : >> { %v831_v6 = vmov (!%p550_p7), 0.0   ;;  %s835_s13 = smov (!%p550_p7), %s310_s0  }
 0x114   : >> { %552 = sbr.rel (%p550_p7) target bundleno = 418 (0x1a2), region = 82 }
 0x11b LB: >>> { %v845_v7 = vmov 0   ;;  %s321_s20 = scalar_lea.vmem %s1044_s5, %s837_s13  ;;  %s320_s21 = sld [smem:[#allocation6 + %s837_s13]]  ;;  %s837_s13 = sphi %s835_s13, %s316_s13   ;;  %v833_v6 = vphi %v831_v6, %v832_v6  }
 0x11c   : >>> { %710 = vset.pattern.permute.xlu0 %v845_v7  ;;  %v322_v8 = vld [vmem:[%s321_s20] sm:$0x1]  ;;  %s316_s13 = sadd.s32 1, %s837_s13  }
 0x11d   : >>> { %327 = vperm.xlu0 %710, %v322_v8   ;;  %p315_p8 = scmp.ge.s32.totalorder %s316_s13, %s312_s12 }
 0x121   : >>> { %s323_s22 = scalar_lea.vmem [#allocation2], %s320_s21 }
 0x122   : >>> { %v324_v9 = vld [vmem:[%s323_s22] sm:$0x1] }
 0x19b   : >> { %318 = sbr.rel (!%p315_p8) target bundleno = 283 (0x11b), region = 88 }
 0x19c   : >>> { %v328_v10 = vpop.permute.xlu0 %327 }
 0x19d   : >>> { %v330_v11 = vmul.f32 %v328_v10, %v324_v9 }
 0x19f   : >>> { %v331_v12 = vadd.f32 %v833_v6, %v330_v11  }
 0x1a1   : >>> { %v832_v6 = vmov %v331_v12   ;;  %v840_v5 = vmov (%p315_p8), %v331_v12  }
 0x1a2 PF: >> { %vm333_vm3 = vcmask 253952   ;;  %s332_s23 = scalar_lea.vmem [#allocation3], %s829_s27  ;;  %s307_s27 = sadd.s32 1, %s829_s27   ;;  %v841_v5 = vphi %v839_v5, %v840_v5  }
 0x1a3   : >> { %334 = vst.msk [vmem:[%s332_s23] sm:$0x1] %vm333_vm3, %v841_v5  ;;  %p304_p9 = scmp.ge.s32.totalorder %s307_s27, 16  }
 0x1a4   : > { %v594_v13 = vld [vmem:[%s1043_s4] ss:$0 sm:$0xff] (%p304_p9)  ;;  %v361_v26 = vlaneseq (%p304_p9)  ;;  %v338_v31 = vld [vmem:[%s1043_s4 + $0x3] sm:$0x1] (%p304_p9)  ;;  %v595_v52 = vld [vmem:[%s1043_s4 + $0x1] ss:$0 sm:$0xff] (%p304_p9) }
 0x1a5   : > { %306 = sbr.rel (!%p304_p9) target bundleno = 265 (0x109), region = 99  ;;  %v596_v55 = vld [vmem:[%s1043_s4 + $0x2] ss:$0 sm:$0xff] (%p304_p9)  ;;  %vm629_vm4 = vmpackc.low (%p304_p9), %vm299_vm2, %vm299_vm2  ;;  %s608_s13 = sshll.u32 (%p304_p9), %s911_s9, 8  ;;  %vm488_vm5 = vcmask (%p304_p9), 130048  }
 0x1a6   : > { %v362_v29 = vshrl.u32 (%p304_p9), %v361_v26, 7  ;;  %s505_s18 = sshll.u32 (%p304_p9), %s950_s26, 4  ;;  %s991_s21 = scalar_lea.hbm (%p304_p9), %s1045_s6, %s608_s13  ;;  %s993_s18 = int_to_ptr.vmem [resolvable:$true] %s505_s18 }
 0x1a7   : > { %s999_s22 = scalar_lea.sflag (%p304_p9), [#allocation8], %s201_s17  ;;  %s745_s9 = scalar_lea.vmem (%p304_p9), %s993_s18, 256 }
 0x1a8   : > { %v363_v33 = vsub.s32 (%p304_p9), 0, %v362_v29  ;;  %p746_p10 = scmp.ne.s32.totalorder (%p304_p9), %s993_s18, %s745_s9  ;;  %s846_s23 = smov (%p304_p9), [#allocation7]  }
 0x1a9   : > { %s749_s24 = sshll.u32 (%p304_p9), %s846_s23, 4  ;;  %s750_s24 = int_to_ptr.vmem [resolvable:$false] %s749_s24 }
 0x1aa   : > { %v339_v14 = vld [vmem:[#allocation3] sm:$0xff] (%p304_p9)  ;;  %v340_v15 = vld [vmem:[#allocation3 + $0x8] sm:$0xff] (%p304_p9)  ;;  %p747_p11 = pnand (%p304_p9), %p746_p10, %p928_p1  ;;  %s751_s25 = scalar_lea.vmem (%p304_p9), %s750_s24, 512 }
 0x1ab   : > { %v345_v16 = vadd.f32 (%p304_p9), %v594_v13, %v339_v14  ;;  %v346_v17 = vadd.f32 (%p304_p9), %v594_v13, %v340_v15  ;;  %p752_p13 = scmp.lt.s32.totalorder (%p304_p9), %s993_s18, %s750_s24  ;;  %p753_p0 = scmp.lt.s32.totalorder (%p304_p9), %s751_s25, %s745_s9 }
 0x1ac   : > { %p748_p12 = pneg %p747_p11 }
 0x1ad   : > { %v347_v18 = vmax.f32 %v345_v16, 0.0  ;;  %v348_v19 = vmax.f32 %v346_v17, 0.0  ;;  %p754_p3 = por %p753_p0, %p752_p13 }
 0x1af   : > { %v349_v20 = vsel %vm299_vm2, %v347_v18, 0.0  ;;  %v350_v21 = vsel %vm299_vm2, %v348_v19, 0.0  ;;  %p755_p4 = pnand %p754_p3, %p748_p12 }
 0x1b0   : > { %v351_v22 = vadd.f32 %v350_v21, %v349_v20 }
 0x1b2   : > { %v352_v23 = vrot.slane %v351_v22, 4 }
 0x1b4   : > { %v353_v24 = vadd.f32 %v352_v23, %v351_v22 }
 0x1b6   : > { %v354_v25 = vrot.slane %v353_v24, 2 }
 0x1b8   : > { %v355_v27 = vadd.f32 %v354_v25, %v353_v24 }
 0x1ba   : > { %v356_v28 = vrot.slane %v355_v27, 1 }
 0x1bc   : > { %v357_v30 = vadd.f32 %v356_v28, %v355_v27 }
 0x1be   : > { %v359_v32 = vmul.f32 0.0625, %v357_v30 }
 0x1c0   : > { %v360_v34 = vmul.f32 %v359_v32, %v338_v31 }
 0x1c2   : > { %v364_v35 = vrot.slane %v360_v34, %v363_v33 }
 0x1c4   : > { %v365_v36 = vsub.f32 %v347_v18, %v364_v35  ;;  %v366_v37 = vsub.f32 %v348_v19, %v364_v35 }
 0x1c6   : > { %v367_v38 = vmul.f32 %v365_v36, %v365_v36  ;;  %v368_v39 = vmul.f32 %v366_v37, %v366_v37 }
 0x1c8   : > { %v369_v40 = vsel %vm299_vm2, %v367_v38, 0.0  ;;  %v370_v41 = vsel %vm299_vm2, %v368_v39, 0.0 }
 0x1c9   : > { %v371_v42 = vadd.f32 %v370_v41, %v369_v40 }
 0x1cb   : > { %v372_v43 = vrot.slane %v371_v42, 4 }
 0x1cd   : > { %v373_v44 = vadd.f32 %v372_v43, %v371_v42 }
 0x1cf   : > { %v374_v45 = vrot.slane %v373_v44, 2 }
 0x1d1   : > { %v375_v46 = vadd.f32 %v374_v45, %v373_v44 }
 0x1d3   : > { %v376_v47 = vrot.slane %v375_v46, 1 }
 0x1d5   : > { %v377_v48 = vadd.f32 %v376_v47, %v375_v46 }
 0x1d7   : > { %v378_v49 = vmul.f32 0.0625, %v377_v48 }
 0x1d9   : > { %v379_v50 = vadd.f32 1e-05, %v378_v49 }
 0x1db   : > { %711 = vrsqrt.f32 %v379_v50 }
 0x1e5   : > { %v712_v51 = vpop.eup %711 }
 0x1e6   : > { %v381_v53 = vmul.f32 %v712_v51, %v365_v36  ;;  %v382_v54 = vmul.f32 %v712_v51, %v366_v37 }
 0x1e8   : > { %v387_v56 = vmul.f32 %v595_v52, %v381_v53  ;;  %v388_v57 = vmul.f32 %v595_v52, %v382_v54 }
 0x1ea   : > { %v393_v58 = vadd.f32 %v596_v55, %v387_v56  ;;  %v394_v59 = vadd.f32 %v596_v55, %v388_v57 }
 0x1ec   : > { %v628_v60 = vpack.c.bf16 %v394_v59, %v393_v58  ;;  %625 = vmatprep.mubr.msk.f32.mxu1 %vm299_vm2, %v393_v58 }
 0x1ee   : > { %630 = vmatprep.subr.msk.bf16.mxu1 %vm629_vm4, %v628_v60 }
 0x1ef   : > { %633 = vmatpush3.bf16.xpose.msk.msra.mxu1 %vm629_vm4, %v628_v60 }
 0x1f6   : > { %626 = vmatmul.mubr.msk.f32.vlgmr.msra.gmra.mrb[0].mxu1 %vm299_vm2, %v394_v59 }
 0x2c9   : > { %v627_v61 = vpop.f32.mrb[0].mxu1 }
 0x2ca   : > { %v602_v62 = vmul.f32 -1.442695, %v627_v61  ;;  %v467_v63 = vpop.f32.mrb[1].mxu1 }
 0x2cb   : > { %v601_v0 = vmul.f32 -1.442695, %v467_v63 }
 0x2cc   : > { %713 = vpow2.f32 %v602_v62 }
 0x2cd   : > { %715 = vpow2.f32 %v601_v0 }
 0x2d6   : > { %v714_v1 = vpop.eup %713 }
 0x2d7   : > { %v716_v2 = vpop.eup %715  ;;  %v483_v3 = vadd.f32 1.0, %v714_v1 }
 0x2d8   : > { %v482_v4 = vadd.f32 1.0, %v716_v2 }
 0x2d9   : > { %717 = vrcp.f32 %v483_v3 }
 0x2da   : > { %719 = vrcp.f32 %v482_v4 }
 0x2e3   : > { %v718_v5 = vpop.eup %717 }
 0x2e4   : > { %v720_v6 = vpop.eup %719  ;;  %490 = vst.msk [vmem:[%s950_s26 + $0x8] sm:$0xff] %vm488_vm5, %v718_v5 }
 0x2e5   : > { %489 = vst.msk [vmem:[%s950_s26] sm:$0xff] %vm488_vm5, %v720_v6 }
 0x2e6   : > { %758 = shalt.err (!%p755_p4)
}
 0x2e7   : > { %s759_s17 = scalar_lea.hbm %s991_s21, 256  ;;  %s763_s28 = scalar_lea.hbm %s1045_s6, 512 }
 0x2e8   : > { %p760_p5 = scmp.ne.s32.totalorder %s991_s21, %s759_s17  ;;  %p764_p8 = scmp.lt.u32.totalorder %s991_s21, %s1045_s6 }
 0x2e9   : > { %p765_p9 = scmp.lt.u32.totalorder %s763_s28, %s759_s17  ;;  %p767_p11 = scmp.lt.u32.totalorder %s759_s17, %s991_s21 }
 0x2ea   : > { %p761_p6 = pnand %p760_p5, %p928_p1 }
 0x2eb   : > { %p766_p10 = por %p765_p9, %p764_p8 }
 0x2ec   : > { %p762_p7 = pneg %p761_p6 }
 0x2ed   : > { %p768_p12 = por %p767_p11, %p766_p10 }
 0x2ef   : > { %p769_p13 = pnand %p768_p12, %p762_p7 }
 0x2f1   : > { %772 = shalt.err (!%p769_p13)
}
 0x2f2   : > { %s847_s10 = smov 128   ;;  %s848_s12 = smov 8  }
 0x2f3   : > { %634 = dma.vmem_to_hbm [thread:$0]  (%p928_p1), %s993_s18, 256, %s991_s21, %s999_s22, %s847_s10, %s847_s10, %s848_s12  }
 0x2f4 PF: > { %p640_p0 = scmp.ge.s32.totalorder %s825_s8, 2  ;;  %s520_s13 = sand.u32 1, %s813_s1  }
 0x2f5   : > { %s521_s19 = scalar_lea.sflag [#allocation8], %s520_s13 }
 0x2f6   : > { %p637_p3 = pnand %p640_p0, %p932_p2 }
 0x2f8   : > { %808 = dma.done.wait (!%p637_p3), %s521_s19, 256  }
 0x2f9   : > { %810 = vsyncadd (!%p637_p3), %s521_s19, 4294967040  ;;  %p26_p4 = scmp.ge.s32.totalorder %s915_s11, 4   ;;  %s1049_s1 = smov %s817_s30 }
 0x2fa   : > { %s1050_s30 = smov %s821_s7  ;;  %s1051_s7 = smov %s926_s14 }
 0x2fb   : > { %s1052_s8 = smov %s915_s11  ;;  %28 = sbr.rel (!%p26_p4) target bundleno = 28 (0x1c), region = 110 }
 0x302   :  { %526 = vsyncpa [#allocation8], 1 }
 0x303   :  { %528 = vsyncpa [#allocation8 + $0x1], 1 }

</bundles_post_ra>
